<compile_context>
chip_gen: v5e
topology: v5e:2x2
jax: 0.10.0
libtpu: 0.0.40
codegen_flags: <defaults>
</compile_context>

<pallas_src>
import math

import jax
import jax.numpy as jnp
from jax.experimental import pallas as pl
from jax.experimental.pallas import tpu as pltpu


def _monotonic_kernel(lo_ref, hi_ref, x_ref, o_ref):
    # Per-column clamp: y = min(max(x, lo), hi); lo/hi are (1, tl) rows that
    # broadcast over the sublane (row) axis of the (tb, tl) x block.
    o_ref[...] = jnp.minimum(jnp.maximum(x_ref[...], lo_ref[...]), hi_ref[...])


def _segment_sizes(units, activation_weights):
    # Python round() (banker's rounding) on purpose: the PyTorch module calls
    # Python round() on the same float expression, so segment boundaries match
    # the reference exactly, including exact-.5 cases.
    total = activation_weights[0] + activation_weights[1] + activation_weights[2]
    s_convex = round(activation_weights[0] * units / total)
    s_concave = round(activation_weights[1] * units / total)
    s_saturated = units - s_convex - s_concave
    return s_convex, s_concave, s_saturated


def _round_down(v, m):
    return (v // m) * m


def _round_up(v, m):
    return ((v + m - 1) // m) * m


def monotonic_activation(x, activation_weights=(1.0, 1.0, 1.0), *, donate_input=False):
    """Pallas implementation of MonotonicActivation.forward for 2-D (batch, units) inputs."""
    batch, units = x.shape
    dtype = x.dtype
    if not jnp.issubdtype(dtype, jnp.floating):
        # +/-inf clamp bounds require a float dtype (no inf for int/fp8 types).
        raise TypeError(f"monotonic_activation requires a floating dtype, got {dtype}")

    s_convex, s_concave, s_saturated = _segment_sizes(units, activation_weights)
    itemsize = jnp.dtype(dtype).itemsize

    # Per-column clamp bounds in the input dtype (no upcast anywhere in the kernel).
    lo = jnp.concatenate([
        jnp.zeros((s_convex,), dtype),
        jnp.full((s_concave,), -jnp.inf, dtype),
        jnp.full((s_saturated,), -1.0, dtype),
    ])
    hi = jnp.concatenate([
        jnp.full((s_convex,), jnp.inf, dtype),
        jnp.zeros((s_concave,), dtype),
        jnp.full((s_saturated,), 1.0, dtype),
    ])

    # Always present a lane-dense (multiple-of-128) last dim to the kernel:
    # fold `fold` rows together when units % 128 != 0, padding the batch up to
    # a multiple of `fold` first if needed; lo/hi tile along with the fold.
    rows, lanes, fold, pad_rows = batch, units, 1, 0
    if units % 128 != 0:
        fold = 128 // math.gcd(units, 128)
        padded_batch = _round_up(batch, fold)
        pad_rows = padded_batch - batch
        rows = padded_batch // fold
        lanes = units * fold  # == lcm(units, 128) * k  -> multiple of 128

    if fold > 1:
        x_k = jnp.pad(x, ((0, pad_rows), (0, 0))) if pad_rows else x
        x_k = x_k.reshape(rows, lanes)
        lo_k = jnp.tile(lo, fold)[None, :]
        hi_k = jnp.tile(hi, fold)[None, :]
    else:
        x_k, lo_k, hi_k = x, lo[None, :], hi[None, :]

    # ---- Tiling: ~8 MiB per block, explicit 48 MiB scoped-VMEM limit --------
    block_budget = 8 * 1024 * 1024

    # Lane tile: full width unless 8 full-width rows already exceed the budget.
    if lanes * 8 * itemsize <= block_budget:
        tl = lanes
    else:
        tl = max(128, _round_down(block_budget // (8 * itemsize), 128))
        tl = min(tl, lanes)  # lanes is always a multiple of 128 here

    # Row tile: multiple of 8 (or full extent when rows <= 8).
    if rows <= 8:
        tb = rows
    else:
        tb = max(8, _round_down(block_budget // (tl * itemsize), 8))
        tb = min(tb, _round_down(rows, 8))
        # Guarantee enough grid steps for megacore sharding + DMA/compute overlap.
        if rows >= 16:
            min_row_steps = 2 if rows < 32 else 4
            if pl.cdiv(rows, tb) < min_row_steps:
                tb = max(8, _round_down(rows // min_row_steps, 8))

    grid = (pl.cdiv(rows, tb), pl.cdiv(lanes, tl))

    n_elems = rows * lanes
    cost = pl.CostEstimate(
        flops=2 * n_elems,
        transcendentals=0,
        bytes_accessed=2 * n_elems * itemsize,
    )

    extra_kwargs = {}
    if donate_input:
        # x (kernel input index 2) aliases the output: no separate output alloc.
        extra_kwargs["input_output_aliases"] = {2: 0}

    out = pl.pallas_call(
        _monotonic_kernel,
        out_shape=jax.ShapeDtypeStruct((rows, lanes), dtype),
        grid=grid,
        in_specs=[
            pl.BlockSpec((1, tl), lambda i, j: (0, j)),    # lo (row-invariant)
            pl.BlockSpec((1, tl), lambda i, j: (0, j)),    # hi (row-invariant)
            pl.BlockSpec((tb, tl), lambda i, j: (i, j)),   # x  (pipelined)
        ],
        out_specs=pl.BlockSpec((tb, tl), lambda i, j: (i, j)),
        compiler_params=pltpu.CompilerParams(
            dimension_semantics=("parallel", "parallel"),
            vmem_limit_bytes=48 * 1024 * 1024,
        ),
        cost_estimate=cost,
        **extra_kwargs,
    )(lo_k, hi_k, x_k)

    out = out.reshape(-1, units)
    if pad_rows:
        out = out[:batch]
    return out


def _reference(x, activation_weights=(1.0, 1.0, 1.0)):
    """Pure-JAX reference mirroring the PyTorch module."""
    units = x.shape[1]
    s_convex, s_concave, s_saturated = _segment_sizes(units, activation_weights)
    x_cx = x[:, :s_convex]
    x_cc = x[:, s_convex:s_convex + s_concave]
    x_sa = x[:, s_convex + s_concave:]
    relu = lambda v: jnp.maximum(v, 0.0)
    cc = relu(jnp.ones_like(x_sa) * 1.0)
    y_cx = relu(x_cx)
    y_cc = -relu(-x_cc)
    y_sa = 1.0 * jnp.where(x_sa <= 0, relu(x_sa + 1.0) - cc, -relu(-(x_sa - 1.0)) + cc)
    return jnp.concatenate([y_cx, y_cc, y_sa], axis=-1)


if __name__ == "__main__":
    key = jax.random.PRNGKey(0)

    # (8, 32): units % 128 != 0 exercises the no-pad row-folding path
    # (8x32 -> lane-dense 2x128 inside the kernel).
    batch, units = 8, 32
    x = jax.random.normal(key, (batch, units), dtype=jnp.float32) * 2.0
    out = jax.block_until_ready(monotonic_activation(x))
    ref = _reference(x)
    assert out.shape == x.shape
    assert jnp.allclose(out, ref, atol=1e-6), "mismatch vs reference (fold)"

    # (36, 256): lane-dense units, row tiling with >=2 grid steps and a partial last block.
    x2 = jax.random.normal(jax.random.PRNGKey(1), (36, 256), dtype=jnp.float32) * 2.0
    out2 = jax.block_until_ready(monotonic_activation(x2))
    ref2 = _reference(x2)
    assert out2.shape == x2.shape
    assert jnp.allclose(out2, ref2, atol=1e-6), "mismatch vs reference (tiled)"

    # (10, 32): units % 128 != 0 AND batch % fold != 0 -> pad-fold-slice path.
    x3 = jax.random.normal(jax.random.PRNGKey(2), (10, 32), dtype=jnp.float32) * 2.0
    out3 = jax.block_until_ready(monotonic_activation(x3))
    ref3 = _reference(x3)
    assert out3.shape == x3.shape
    assert jnp.allclose(out3, ref3, atol=1e-6), "mismatch vs reference (padded fold)"

    print("KERNEL_OK")
</pallas_src>

<mosaic_0001>
module attributes {stable_mosaic.version = 11 : i64} {
  func.func @_monotonic_kernel(%arg0: i32, %arg1: i32, %arg2: memref<1x128xf32, #tpu.memory_space<vmem>>, %arg3: memref<1x128xf32, #tpu.memory_space<vmem>>, %arg4: memref<2x128xf32, #tpu.memory_space<vmem>>, %arg5: memref<2x128xf32, #tpu.memory_space<vmem>>) attributes {dimension_semantics = [#tpu.dimension_semantics<parallel>, #tpu.dimension_semantics<parallel>], iteration_bounds = array<i64: 1, 1>, scalar_prefetch = 0 : i64, scratch_operands = 0 : i64, tpu.core_type = #tpu.core_type<tc>, window_params = [{transform_indices = @transform_0, window_bounds = array<i64: 1, 128>}, {transform_indices = @transform_1, window_bounds = array<i64: 1, 128>}, {transform_indices = @transform_2, window_bounds = array<i64: 2, 128>}, {transform_indices = @transform_3, window_bounds = array<i64: 2, 128>}]} {
    %c0 = arith.constant 0 : index
    %c0_0 = arith.constant 0 : index
    %0 = vector.load %arg4[%c0, %c0_0] : memref<2x128xf32, #tpu.memory_space<vmem>>, vector<2x128xf32>
    %c0_1 = arith.constant 0 : index
    %c0_2 = arith.constant 0 : index
    %1 = vector.load %arg2[%c0_1, %c0_2] : memref<1x128xf32, #tpu.memory_space<vmem>>, vector<1x128xf32>
    %2 = vector.broadcast %1 : vector<1x128xf32> to vector<2x128xf32>
    %3 = arith.maximumf %0, %2 : vector<2x128xf32>
    %c0_3 = arith.constant 0 : index
    %c0_4 = arith.constant 0 : index
    %4 = vector.load %arg3[%c0_3, %c0_4] : memref<1x128xf32, #tpu.memory_space<vmem>>, vector<1x128xf32>
    %5 = vector.broadcast %4 : vector<1x128xf32> to vector<2x128xf32>
    %6 = arith.minimumf %3, %5 : vector<2x128xf32>
    %c0_5 = arith.constant 0 : index
    %c0_6 = arith.constant 0 : index
    %7 = vector.load %arg5[%c0_5, %c0_6] : memref<2x128xf32, #tpu.memory_space<vmem>>, vector<2x128xf32>
    tpu.vector_store %arg5[%c0_5, %c0_6], %6 {strides = array<i32>} : memref<2x128xf32, #tpu.memory_space<vmem>>, vector<2x128xf32>,
    return
  }
  func.func @transform_0(%arg0: i32, %arg1: i32) -> (i32, i32) {
    %c0_i32 = arith.constant 0 : i32
    %c0_i32_0 = arith.constant 0 : i32
    return %c0_i32, %arg1 : i32, i32
  }
  func.func @transform_1(%arg0: i32, %arg1: i32) -> (i32, i32) {
    %c0_i32 = arith.constant 0 : i32
    %c0_i32_0 = arith.constant 0 : i32
    return %c0_i32, %arg1 : i32, i32
  }
  func.func @transform_2(%arg0: i32, %arg1: i32) -> (i32, i32) {
    %c0_i32 = arith.constant 0 : i32
    return %arg0, %arg1 : i32, i32
  }
  func.func @transform_3(%arg0: i32, %arg1: i32) -> (i32, i32) {
    %c0_i32 = arith.constant 0 : i32
    return %arg0, %arg1 : i32, i32
  }
}

</mosaic_0001>

<bundles_post_ra>
// kernel: tpu_custom_call.1
= control target key start
LH: loop header
LB: loop body
LE: loop exit
PB: predicated region body
PF: predicated region fallthrough
CT: control target
= control target key end

     0   :  { %8 = vsyncpa [#allocation3], 0  ;;  %s230_s0 = inlined_call_operand.hbm [shape: f32[1,128], index: 0, kind: input, shape index: {}]   ;;  %s231_s1 = inlined_call_operand.hbm [shape: f32[1,128], index: 1, kind: input, shape index: {}]   ;;  %s232_s2 = inlined_call_operand.hbm [shape: f32[2,128], index: 2, kind: input, shape index: {}]   ;;  %s233_s3 = inlined_call_operand.hbm [shape: f32[2,128], index: 3, kind: output, shape index: {}]  }
   0x1   :  { %9 = vsyncpa [#allocation6], 0  ;;  %s27_s14 = sshll.u32 %s231_s1, 4  ;;  %s28_s14 = int_to_ptr.hbm [resolvable:$true] %s27_s14 }
   0x2   :  { %10 = vsyncpa [#allocation4], 0  ;;  %s194_s15 = smov [#allocation5]   ;;  %s16_s19 = sshll.u32 %s230_s0, 4  ;;  %s17_s19 = int_to_ptr.hbm [resolvable:$true] %s16_s19 }
   0x3   :  { %s29_s16 = sshll.u32 %s194_s15, 4  ;;  %s195_s20 = smov [#allocation2]   ;;  %s30_s16 = int_to_ptr.vmem [resolvable:$true] %s29_s16 }
   0x4   :  { %32 = dma.hbm_to_vmem [thread:$0]  %s28_s14, 16, %s30_s16, [#allocation6]  }
   0x5   :  { %s18_s21 = sshll.u32 %s195_s20, 4  ;;  %s38_s24 = sshll.u32 %s232_s2, 4  ;;  %s19_s21 = int_to_ptr.vmem [resolvable:$true] %s18_s21  ;;  %s39_s24 = int_to_ptr.hbm [resolvable:$true] %s38_s24 }
   0x6   :  { %21 = dma.hbm_to_vmem [thread:$0]  %s17_s19, 16, %s19_s21, [#allocation3]  }
   0x7   :  { %s196_s1 = smov [#allocation7]  }
   0x8   :  { %s40_s25 = sshll.u32 %s196_s1, 4  ;;  %s41_s25 = int_to_ptr.vmem [resolvable:$true] %s40_s25 }
   0x9   :  { %43 = dma.hbm_to_vmem [thread:$0]  %s39_s24, 32, %s41_s25, [#allocation6]  }
   0xa   :  { %188 = dma.done.wait [#allocation3], 16  }
   0xb   :  { %189 = vsyncadd [#allocation3], 4294967280 }
   0xc   :  { %190 = dma.done.wait [#allocation6], 48  }
   0xd   :  { %191 = vsyncadd [#allocation6], 4294967248  ;;  %v56_v0 = vld [vmem:[#allocation7] sm:$0x3]  ;;  %v90_v1 = vld [vmem:[#allocation2] ss:$0 sm:$0xff] }
   0xe   :  { %v91_v2 = vld [vmem:[#allocation5] ss:$0 sm:$0xff]  ;;  %s197_s0 = smov [#allocation8]   ;;  %s75_s2 = sshll.u32 %s233_s3, 4  ;;  %v61_v3 = vmax.f32 %v56_v0, %v90_v1  ;;  %s76_s2 = int_to_ptr.hbm [resolvable:$true] %s75_s2 }
   0xf   :  { %s73_s26 = sshll.u32 %s197_s0, 4  ;;  %s74_s26 = int_to_ptr.vmem [resolvable:$true] %s73_s26 }
  0x10   :  { %v66_v4 = vmin.f32 %v61_v3, %v91_v2 }
  0x12   :  { %67 = vst [vmem:[#allocation8] sm:$0x3] %v66_v4 }
  0x13   :  { %78 = dma.vmem_to_hbm [thread:$0]  %s74_s26, 32, %s76_s2, [#allocation4]  }
  0x14   :  { %192 = dma.done.wait [#allocation4], 32  }
  0x15   :  { %193 = vsyncadd [#allocation4], 4294967264 }
  0x16   :  { %83 = vsyncpa [#allocation3], 1 }
  0x17   :  { %84 = vsyncpa [#allocation6], 1 }
  0x18   :  { %85 = vsyncpa [#allocation4], 1 }

</bundles_post_ra>
